<compile_context>
chip_gen: v6e
topology: v6e:2x2x1
jax: 0.10.0
libtpu: 0.0.40
codegen_flags: <defaults>
</compile_context>

<pallas_src>
import jax
import jax.numpy as jnp
import numpy as np
from jax.experimental import pallas as pl
from jax.experimental.pallas import tpu as pltpu


def _round_up(a, m):
    return (a + m - 1) // m * m


def daclnet_head_kernel(x_ref, w0_ref, b0_ref, w1_ref, b1_ref, w2_ref, b2_ref,
                        out_ref, *, inv_hw):
    # x_ref: [TN, C, HW] float32 tile (NCHW with spatial flattened; HW on lanes).
    x = x_ref[...]

    # AdaptiveAvgPool2d(1) + flatten -> [TN, C]   (cross-lane reduce on XLU).
    pooled = jnp.sum(x, axis=-1) * inv_hw

    # nn.Dropout in eval mode is the identity (inference semantics).

    # classifier[0]: Linear(C -> h0) + ReLU (mobilenetv2 activation) + dropout
    h = jnp.dot(pooled, w0_ref[...], preferred_element_type=jnp.float32)
    h = jnp.maximum(h + b0_ref[...], 0.0)

    # classifier[1]: Linear(h0 -> h1) + ReLU + dropout
    h = jnp.dot(h, w1_ref[...], preferred_element_type=jnp.float32)
    h = jnp.maximum(h + b1_ref[...], 0.0)

    # classifier[2]: Linear(h1 -> num_class_padded) -> logits (no activation)
    logits = jnp.dot(h, w2_ref[...], preferred_element_type=jnp.float32)
    logits = logits + b2_ref[...]

    out_ref[...] = logits.astype(out_ref.dtype)


def _choose_batch_tile(n, hw, c, itemsize=4, budget_bytes=4 << 20):
    """Batch tile: multiple of 8 sublanes, per-step x tile <= ~4 MiB so the
    double-buffered pipeline fits every generation's default scoped VMEM."""
    per_row = max(hw * c * itemsize, 1)
    tn = max(8, min(128, (budget_bytes // per_row) // 8 * 8))
    tn = min(tn, _round_up(n, 8))
    n_pad = _round_up(n, tn)
    return tn, n_pad


def daclnet_head(x_nchw, params):
    """x_nchw: [N, C, H, W] float32 feature map (output of the frozen base)."""
    N, C, H, W = x_nchw.shape
    w0, b0, w1, b1, w2, b2 = params
    num_class = w2.shape[1]
    HW = H * W

    # Free metadata reshape: NCHW -> [N, C, HW] (trailing dims merge, no copy).
    x3 = x_nchw.reshape(N, C, HW)

    # Lane-dense output: pad num_class up to a multiple of 128 (unmasked vst).
    ncp = _round_up(max(num_class, 1), 128)
    w2p = jnp.pad(w2, ((0, 0), (0, ncp - num_class)))
    b2p = jnp.pad(b2, ((0, 0), (0, ncp - num_class)))

    # Batch tiling + padding.
    tn, n_pad = _choose_batch_tile(N, HW, C)
    if n_pad != N:
        x3 = jnp.pad(x3, ((0, n_pad - N), (0, 0), (0, 0)))
    grid = (n_pad // tn,)

    # Weights/biases map to a constant block -> VMEM-resident across the grid.
    const_spec = lambda a: pl.BlockSpec(a.shape, lambda i: (0,) * a.ndim)

    import functools
    kernel = functools.partial(daclnet_head_kernel, inv_hw=float(1.0 / HW))

    out_padded = pl.pallas_call(
        kernel,
        out_shape=jax.ShapeDtypeStruct((n_pad, ncp), jnp.float32),
        grid=grid,
        in_specs=[
            pl.BlockSpec((tn, C, HW), lambda i: (i, 0, 0)),   # x tile (pipelined)
            const_spec(w0), const_spec(b0),
            const_spec(w1), const_spec(b1),
            const_spec(w2p), const_spec(b2p),
        ],
        out_specs=pl.BlockSpec((tn, ncp), lambda i: (i, 0)),
        compiler_params=pltpu.CompilerParams(
            dimension_semantics=("parallel",),          # megacore sharding
            vmem_limit_bytes=32 * 1024 * 1024,
        ),
    )(x3, w0, b0, w1, b1, w2p, b2p)

    return out_padded[:N, :num_class]


def init_params(key, in_features, hidden_layers, num_class):
    """Deterministic init mirroring nn.Linear default (U(-1/sqrt(fan_in), ...)).
    Weights are stored as [in, out] (transposed vs torch) for direct x @ W."""
    sizes = [in_features] + list(hidden_layers) + [num_class]
    params = []
    for i in range(len(sizes) - 1):
        fan_in, fan_out = sizes[i], sizes[i + 1]
        key, kw, kb = jax.random.split(key, 3)
        bound = 1.0 / np.sqrt(fan_in)
        w = jax.random.uniform(kw, (fan_in, fan_out), jnp.float32, -bound, bound)
        b = jax.random.uniform(kb, (1, fan_out), jnp.float32, -bound, bound)
        params += [w, b]
    return tuple(params)


def reference_forward(x_nchw, params):
    """Pure-JAX reference of the same forward (sanity check)."""
    w0, b0, w1, b1, w2, b2 = params
    x = jnp.mean(x_nchw, axis=(2, 3))                # adaptive avg pool + flatten
    x = jnp.maximum(
        jnp.dot(x, w0, precision=jax.lax.Precision.HIGHEST) + b0, 0.0)
    x = jnp.maximum(
        jnp.dot(x, w1, precision=jax.lax.Precision.HIGHEST) + b1, 0.0)
    return jnp.dot(x, w2, precision=jax.lax.Precision.HIGHEST) + b2


if __name__ == "__main__":
    # Small synthetic shapes consistent with the head of DaclNet('mobilenetv2',
    # hidden_layers=[32, 16], num_class=6): base feature map [N, C, H, W].
    N, C, H, W = 2, 64, 16, 16
    hidden_layers = [32, 16]
    num_class = 6

    key = jax.random.PRNGKey(0)
    key, kx = jax.random.split(key)
    x = jax.random.normal(kx, (N, C, H, W), jnp.float32)

    params = init_params(key, C, hidden_layers, num_class)

    logits = daclnet_head(x, params)
    logits = jax.block_until_ready(logits)

    ref = reference_forward(x, params)
    assert logits.shape == (N, num_class)
    np.testing.assert_allclose(np.asarray(logits), np.asarray(ref),
                               rtol=2e-3, atol=2e-3)
    print("KERNEL_OK")
</pallas_src>

<mosaic_0001>
module attributes {stable_mosaic.version = 11 : i64} {
  func.func @daclnet_head_kernel(%arg0: i32, %arg1: memref<8x64x256xf32, #tpu.memory_space<vmem>>, %arg2: memref<64x32xf32, #tpu.memory_space<vmem>>, %arg3: memref<1x32xf32, #tpu.memory_space<vmem>>, %arg4: memref<32x16xf32, #tpu.memory_space<vmem>>, %arg5: memref<1x16xf32, #tpu.memory_space<vmem>>, %arg6: memref<16x128xf32, #tpu.memory_space<vmem>>, %arg7: memref<1x128xf32, #tpu.memory_space<vmem>>, %arg8: memref<8x128xf32, #tpu.memory_space<vmem>>) attributes {dimension_semantics = [#tpu.dimension_semantics<parallel>], iteration_bounds = array<i64: 1>, scalar_prefetch = 0 : i64, scratch_operands = 0 : i64, tpu.core_type = #tpu.core_type<tc>, window_params = [{transform_indices = @transform_0, window_bounds = array<i64: 8, 64, 256>}, {pipeline_mode = #tpu.pipeline_mode<synchronous>, transform_indices = @transform_1, window_bounds = array<i64: 64, 32>}, {pipeline_mode = #tpu.pipeline_mode<synchronous>, transform_indices = @transform_2, window_bounds = array<i64: 1, 32>}, {pipeline_mode = #tpu.pipeline_mode<synchronous>, transform_indices = @transform_3, window_bounds = array<i64: 32, 16>}, {pipeline_mode = #tpu.pipeline_mode<synchronous>, transform_indices = @transform_4, window_bounds = array<i64: 1, 16>}, {pipeline_mode = #tpu.pipeline_mode<synchronous>, transform_indices = @transform_5, window_bounds = array<i64: 16, 128>}, {pipeline_mode = #tpu.pipeline_mode<synchronous>, transform_indices = @transform_6, window_bounds = array<i64: 1, 128>}, {transform_indices = @transform_7, window_bounds = array<i64: 8, 128>}]} {
    %c0 = arith.constant 0 : index
    %c0_0 = arith.constant 0 : index
    %c0_1 = arith.constant 0 : index
    %0 = vector.load %arg1[%c0, %c0_0, %c0_1] : memref<8x64x256xf32, #tpu.memory_space<vmem>>, vector<8x64x256xf32>
    %cst = arith.constant dense<0.000000e+00> : vector<8x64xf32>
    %1 = vector.multi_reduction <add>, %0, %cst [2] : vector<8x64x256xf32> to vector<8x64xf32>
    %cst_2 = arith.constant 3.906250e-03 : f32
    %2 = vector.broadcast %cst_2 : f32 to vector<8x64xf32>
    %3 = arith.mulf %1, %2 : vector<8x64xf32>
    %c0_3 = arith.constant 0 : index
    %c0_4 = arith.constant 0 : index
    %4 = vector.load %arg2[%c0_3, %c0_4] : memref<64x32xf32, #tpu.memory_space<vmem>>, vector<64x32xf32>
    %cst_5 = arith.constant dense<0.000000e+00> : vector<8x32xf32>
    %5 = tpu.matmul %3, %4, %cst_5 {dimension_numbers = #tpu.dot_dimension_numbers<[1], [0], [0], [1], [0, 0, 1, 1], [], []>} : vector<8x64xf32>, vector<64x32xf32>, vector<8x32xf32> -> vector<8x32xf32>
    %c0_6 = arith.constant 0 : index
    %c0_7 = arith.constant 0 : index
    %6 = vector.load %arg3[%c0_6, %c0_7] : memref<1x32xf32, #tpu.memory_space<vmem>>, vector<1x32xf32>
    %7 = vector.broadcast %6 : vector<1x32xf32> to vector<8x32xf32>
    %8 = arith.addf %5, %7 : vector<8x32xf32>
    %cst_8 = arith.constant 0.000000e+00 : f32
    %9 = vector.broadcast %cst_8 : f32 to vector<8x32xf32>
    %10 = arith.maximumf %8, %9 : vector<8x32xf32>
    %c0_9 = arith.constant 0 : index
    %c0_10 = arith.constant 0 : index
    %11 = vector.load %arg4[%c0_9, %c0_10] : memref<32x16xf32, #tpu.memory_space<vmem>>, vector<32x16xf32>
    %cst_11 = arith.constant dense<0.000000e+00> : vector<8x16xf32>
    %12 = tpu.matmul %10, %11, %cst_11 {dimension_numbers = #tpu.dot_dimension_numbers<[1], [0], [0], [1], [0, 0, 1, 1], [], []>} : vector<8x32xf32>, vector<32x16xf32>, vector<8x16xf32> -> vector<8x16xf32>
    %c0_12 = arith.constant 0 : index
    %c0_13 = arith.constant 0 : index
    %13 = vector.load %arg5[%c0_12, %c0_13] : memref<1x16xf32, #tpu.memory_space<vmem>>, vector<1x16xf32>
    %14 = vector.broadcast %13 : vector<1x16xf32> to vector<8x16xf32>
    %15 = arith.addf %12, %14 : vector<8x16xf32>
    %cst_14 = arith.constant 0.000000e+00 : f32
    %16 = vector.broadcast %cst_14 : f32 to vector<8x16xf32>
    %17 = arith.maximumf %15, %16 : vector<8x16xf32>
    %c0_15 = arith.constant 0 : index
    %c0_16 = arith.constant 0 : index
    %18 = vector.load %arg6[%c0_15, %c0_16] : memref<16x128xf32, #tpu.memory_space<vmem>>, vector<16x128xf32>
    %cst_17 = arith.constant dense<0.000000e+00> : vector<8x128xf32>
    %19 = tpu.matmul %17, %18, %cst_17 {dimension_numbers = #tpu.dot_dimension_numbers<[1], [0], [0], [1], [0, 0, 1, 1], [], []>} : vector<8x16xf32>, vector<16x128xf32>, vector<8x128xf32> -> vector<8x128xf32>
    %c0_18 = arith.constant 0 : index
    %c0_19 = arith.constant 0 : index
    %20 = vector.load %arg7[%c0_18, %c0_19] : memref<1x128xf32, #tpu.memory_space<vmem>>, vector<1x128xf32>
    %21 = vector.broadcast %20 : vector<1x128xf32> to vector<8x128xf32>
    %22 = arith.addf %19, %21 : vector<8x128xf32>
    %c0_20 = arith.constant 0 : index
    %c0_21 = arith.constant 0 : index
    %23 = vector.load %arg8[%c0_20, %c0_21] : memref<8x128xf32, #tpu.memory_space<vmem>>, vector<8x128xf32>
    tpu.vector_store %arg8[%c0_20, %c0_21], %22 {strides = array<i32>} : memref<8x128xf32, #tpu.memory_space<vmem>>, vector<8x128xf32>,
    return
  }
  func.func @transform_0(%arg0: i32) -> (i32, i32, i32) {
    %c0_i32 = arith.constant 0 : i32
    %c0_i32_0 = arith.constant 0 : i32
    %c0_i32_1 = arith.constant 0 : i32
    return %arg0, %c0_i32, %c0_i32_0 : i32, i32, i32
  }
  func.func @transform_1(%arg0: i32) -> (i32, i32) {
    %c0_i32 = arith.constant 0 : i32
    %c0_i32_0 = arith.constant 0 : i32
    %c0_i32_1 = arith.constant 0 : i32
    return %c0_i32, %c0_i32_0 : i32, i32
  }
  func.func @transform_2(%arg0: i32) -> (i32, i32) {
    %c0_i32 = arith.constant 0 : i32
    %c0_i32_0 = arith.constant 0 : i32
    %c0_i32_1 = arith.constant 0 : i32
    return %c0_i32, %c0_i32_0 : i32, i32
  }
  func.func @transform_3(%arg0: i32) -> (i32, i32) {
    %c0_i32 = arith.constant 0 : i32
    %c0_i32_0 = arith.constant 0 : i32
    %c0_i32_1 = arith.constant 0 : i32
    return %c0_i32, %c0_i32_0 : i32, i32
  }
  func.func @transform_4(%arg0: i32) -> (i32, i32) {
    %c0_i32 = arith.constant 0 : i32
    %c0_i32_0 = arith.constant 0 : i32
    %c0_i32_1 = arith.constant 0 : i32
    return %c0_i32, %c0_i32_0 : i32, i32
  }
  func.func @transform_5(%arg0: i32) -> (i32, i32) {
    %c0_i32 = arith.constant 0 : i32
    %c0_i32_0 = arith.constant 0 : i32
    %c0_i32_1 = arith.constant 0 : i32
    return %c0_i32, %c0_i32_0 : i32, i32
  }
  func.func @transform_6(%arg0: i32) -> (i32, i32) {
    %c0_i32 = arith.constant 0 : i32
    %c0_i32_0 = arith.constant 0 : i32
    %c0_i32_1 = arith.constant 0 : i32
    return %c0_i32, %c0_i32_0 : i32, i32
  }
  func.func @transform_7(%arg0: i32) -> (i32, i32) {
    %c0_i32 = arith.constant 0 : i32
    %c0_i32_0 = arith.constant 0 : i32
    return %arg0, %c0_i32 : i32, i32
  }
}

</mosaic_0001>

<bundles_post_ra>
// kernel: tpu_custom_call.1
= control target key start
LH: loop header
LB: loop body
LE: loop exit
PB: predicated region body
PF: predicated region fallthrough
CT: control target
= control target key end

     0   :  { %12 = vsyncpa [#allocation3], 0  ;;  %s1520_s0 = inlined_call_operand.hbm [shape: f32[8,64,256], index: 0, kind: input, shape index: {}]   ;;  %s1521_s1 = inlined_call_operand.vmem [shape: f32[64,32], index: 1, kind: input, shape index: {}]   ;;  %s1522_s2 = inlined_call_operand.vmem [shape: f32[1,32], index: 2, kind: input, shape index: {}]   ;;  %s1523_s3 = inlined_call_operand.vmem [shape: f32[32,16], index: 3, kind: input, shape index: {}]   ;;  %s1524_s4 = inlined_call_operand.vmem [shape: f32[1,16], index: 4, kind: input, shape index: {}]   ;;  %s1525_s5 = inlined_call_operand.vmem [shape: f32[16,128], index: 5, kind: input, shape index: {}]   ;;  %s1526_s6 = inlined_call_operand.vmem [shape: f32[1,128], index: 6, kind: input, shape index: {}]   ;;  %s1527_s7 = inlined_call_operand.hbm [shape: f32[8,128], index: 7, kind: output, shape index: {}]  }
   0x1   :  { %13 = vsyncpa [#allocation4], 0  ;;  %s1215_s24 = smov [#allocation2]  }
   0x2   :  { %s19_s25 = sshll.u32 %s1215_s24, 4  ;;  %s20_s25 = int_to_ptr.vmem [resolvable:$true] %s19_s25 }
   0x3   :  { %s1179_s26 = scalar_lea.vmem %s20_s25, 16384  ;;  %p1184_p1 = scmp.lt.s32.totalorder %s20_s25, %s20_s25 }
   0x4   :  { %p1180_p0 = scmp.ne.s32.totalorder %s20_s25, %s1179_s26  ;;  %p1185_p2 = scmp.lt.s32.totalorder %s1179_s26, %s1179_s26 }
   0x6   :  { %p1186_p3 = por %p1185_p2, %p1184_p1 }
   0x8   :  { %p1187_p4 = pnand %p1186_p3, %p1180_p0 }
   0xa   :  { %1190 = shalt.err (!%p1187_p4)
}
   0xb   :  { %s1216_s27 = smov 256   ;;  %s1217_s28 = smov 16  }
   0xc   :  { %25 = dma.hbm_to_vmem [thread:$0]  %s1520_s0, 16384, %s20_s25, [#allocation3], %s1216_s27, %s1216_s27, %s1217_s28  }
   0xd   :  { %1211 = dma.done.wait [#allocation3], 16384  }
   0xe   :  { %1212 = vsyncadd [#allocation3], 4294950912  ;;  %v57_v0 = vld [vmem:[#allocation2 + $0x80] sm:$0xff]  ;;  %v58_v1 = vld [vmem:[#allocation2 + $0x88] sm:$0xff]  ;;  %vm1219_vm0 = vmmov 0   ;;  %vm515_vm1 = vcmask 130112  }
   0xf   :  { %v41_v2 = vld [vmem:[#allocation2] sm:$0xff]  ;;  %v193_v3 = vadd.f32 %v58_v1, %v57_v0  ;;  %v42_v4 = vld [vmem:[#allocation2 + $0x8] sm:$0xff]  ;;  %v59_v5 = vld [vmem:[#allocation2 + $0x90] sm:$0xff]  ;;  %vm522_vm2 = vcmask 195712   ;;  %vm529_vm3 = vcmask 261312   ;;  %vm536_vm4 = vcmask 326912  }
  0x10   :  { %v60_v6 = vld [vmem:[#allocation2 + $0x98] sm:$0xff]  ;;  %v169_v7 = vadd.f32 %v42_v4, %v41_v2  ;;  %v43_v8 = vld [vmem:[#allocation2 + $0x10] sm:$0xff]  ;;  %v61_v12 = vld [vmem:[#allocation2 + $0xa0] sm:$0xff]  ;;  %vm543_vm5 = vcmask 392512   ;;  %vm550_vm6 = vcmask 458112   ;;  %vm557_vm7 = vcmask 523712  }
  0x11   :  { %v44_v9 = vld [vmem:[#allocation2 + $0x18] sm:$0xff]  ;;  %194 = vadd.xlane.f32.xlu1 %v193_v3  ;;  %v196_v10 = vadd.f32 %v60_v6, %v59_v5  ;;  %v62_v13 = vld [vmem:[#allocation2 + $0xa8] sm:$0xff]  ;;  %v45_v14 = vld [vmem:[#allocation2 + $0x20] sm:$0xff]  ;;  %vm832_vm8 = vcmask 1041409   ;;  %vm834_vm9 = vcmask 1042434   ;;  %vm836_vm10 = vcmask 1043459  }
  0x12   :  { %170 = vadd.xlane.f32.xlu0 %v169_v7  ;;  %v172_v11 = vadd.f32 %v44_v9, %v43_v8  ;;  %v46_v15 = vld [vmem:[#allocation2 + $0x28] sm:$0xff]  ;;  %v199_v16 = vadd.f32 %v62_v13, %v61_v12  ;;  %v75_v18 = vld [vmem:[#allocation2 + $0x110] sm:$0xff]  ;;  %v76_v19 = vld [vmem:[#allocation2 + $0x118] sm:$0xff]  ;;  %vm838_vm11 = vcmask 1044484   ;;  %vm840_vm12 = vcmask 1045509   ;;  %s1220_s14 = smov [#allocation5]  }
  0x13   :  { %v175_v17 = vadd.f32 %v46_v15, %v45_v14  ;;  %v73_v20 = vld [vmem:[#allocation2 + $0x100] sm:$0xff]  ;;  %v74_v21 = vld [vmem:[#allocation2 + $0x108] sm:$0xff]  ;;  %v220_v22 = vadd.f32 %v76_v19, %v75_v18  ;;  %v63_v24 = vld [vmem:[#allocation2 + $0xb0] sm:$0xff]  ;;  %vm842_vm13 = vcmask 1046534   ;;  %vm844_vm14 = vcmask 1047559   ;;  %s1096_s15 = sshll.u32 %s1220_s14, 4  ;;  %s1097_s15 = int_to_ptr.vmem [resolvable:$true] %s1096_s15 }
  0x14   :  { %v217_v23 = vadd.f32 %v74_v21, %v73_v20  ;;  %v64_v25 = vld [vmem:[#allocation2 + $0xb8] sm:$0xff]  ;;  %v47_v26 = vld [vmem:[#allocation2 + $0x30] sm:$0xff]  ;;  %v89_v30 = vld [vmem:[#allocation2 + $0x180] sm:$0xff]  ;;  %vm846_vm15 = vcmask 523264   ;;  %p1196_p6 = scmp.lt.s32.totalorder %s1097_s15, %s1097_s15 }
  0x15   :  { %197 = vadd.xlane.f32.xlu1 %v196_v10  ;;  %v48_v27 = vld [vmem:[#allocation2 + $0x38] sm:$0xff]  ;;  %v202_v28 = vadd.f32 %v64_v25, %v63_v24  ;;  %v90_v31 = vld [vmem:[#allocation2 + $0x188] sm:$0xff]  ;;  %v77_v32 = vld [vmem:[#allocation2 + $0x120] sm:$0xff] }
  0x16   :  { %173 = vadd.xlane.f32.xlu0 %v172_v11  ;;  %v178_v29 = vadd.f32 %v48_v27, %v47_v26  ;;  %v78_v33 = vld [vmem:[#allocation2 + $0x128] sm:$0xff]  ;;  %v241_v34 = vadd.f32 %v90_v31, %v89_v30  ;;  %v49_v36 = vld [vmem:[#allocation2 + $0x40] sm:$0xff]  ;;  %v91_v38 = vld [vmem:[#allocation2 + $0x190] sm:$0xff] }
  0x17   :  { %v223_v35 = vadd.f32 %v78_v33, %v77_v32  ;;  %v50_v37 = vld [vmem:[#allocation2 + $0x48] sm:$0xff]  ;;  %v92_v39 = vld [vmem:[#allocation2 + $0x198] sm:$0xff]  ;;  %v79_v42 = vld [vmem:[#allocation2 + $0x130] sm:$0xff] }
  0x18   :  { %v181_v40 = vadd.f32 %v50_v37, %v49_v36  ;;  %v244_v41 = vadd.f32 %v92_v39, %v91_v38  ;;  %v80_v43 = vld [vmem:[#allocation2 + $0x138] sm:$0xff]  ;;  %v65_v44 = vld [vmem:[#allocation2 + $0xc0] sm:$0xff]  ;;  %v66_v45 = vld [vmem:[#allocation2 + $0xc8] sm:$0xff] }
  0x19   :  { %200 = vadd.xlane.f32.xlu1 %v199_v16  ;;  %v226_v46 = vadd.f32 %v80_v43, %v79_v42  ;;  %v205_v47 = vadd.f32 %v66_v45, %v65_v44  ;;  %v105_v48 = vld [vmem:[#allocation2 + $0x200] sm:$0xff]  ;;  %v106_v49 = vld [vmem:[#allocation2 + $0x208] sm:$0xff]  ;;  %v51_v54 = vld [vmem:[#allocation2 + $0x50] sm:$0xff] }
  0x1a   :  { %176 = vadd.xlane.f32.xlu0 %v175_v17  ;;  %v93_v50 = vld [vmem:[#allocation2 + $0x1a0] sm:$0xff]  ;;  %v94_v51 = vld [vmem:[#allocation2 + $0x1a8] sm:$0xff]  ;;  %v265_v52 = vadd.f32 %v106_v49, %v105_v48  ;;  %v52_v55 = vld [vmem:[#allocation2 + $0x58] sm:$0xff] }
  0x1b   :  { %v247_v53 = vadd.f32 %v94_v51, %v93_v50  ;;  %v107_v56 = vld [vmem:[#allocation2 + $0x210] sm:$0xff]  ;;  %v108_v57 = vld [vmem:[#allocation2 + $0x218] sm:$0xff]  ;;  %v184_v58 = vadd.f32 %v52_v55, %v51_v54  ;;  %v81_v60 = vld [vmem:[#allocation2 + $0x140] sm:$0xff] }
  0x1c   :  { %v268_v59 = vadd.f32 %v108_v57, %v107_v56  ;;  %v82_v61 = vld [vmem:[#allocation2 + $0x148] sm:$0xff]  ;;  %v67_v62 = vld [vmem:[#allocation2 + $0xd0] sm:$0xff]  ;;  %v68_v63 = vld [vmem:[#allocation2 + $0xd8] sm:$0xff] }
  0x1d   :  { %221 = vadd.xlane.f32.xlu1 %v220_v22  ;;  %v229_v0 = vadd.f32 %v82_v61, %v81_v60  ;;  %v208_v1 = vadd.f32 %v68_v63, %v67_v62  ;;  %v109_v2 = vld [vmem:[#allocation2 + $0x220] sm:$0xff]  ;;  %v110_v3 = vld [vmem:[#allocation2 + $0x228] sm:$0xff]  ;;  %v95_v4 = vld [vmem:[#allocation2 + $0x1b0] sm:$0xff] }
  0x1e   :  { %218 = vadd.xlane.f32.xlu0 %v217_v23  ;;  %v96_v5 = vld [vmem:[#allocation2 + $0x1b8] sm:$0xff]  ;;  %v271_v6 = vadd.f32 %v110_v3, %v109_v2  ;;  %v123_v8 = vld [vmem:[#allocation2 + $0x290] sm:$0xff]  ;;  %v121_v10 = vld [vmem:[#allocation2 + $0x280] sm:$0xff] }
  0x1f   :  { %v250_v7 = vadd.f32 %v96_v5, %v95_v4  ;;  %v124_v9 = vld [vmem:[#allocation2 + $0x298] sm:$0xff]  ;;  %v122_v11 = vld [vmem:[#allocation2 + $0x288] sm:$0xff]  ;;  %v69_v14 = vld [vmem:[#allocation2 + $0xe0] sm:$0xff] }
  0x20   :  { %v292_v12 = vadd.f32 %v124_v9, %v123_v8  ;;  %v289_v13 = vadd.f32 %v122_v11, %v121_v10  ;;  %v70_v15 = vld [vmem:[#allocation2 + $0xe8] sm:$0xff]  ;;  %v53_v16 = vld [vmem:[#allocation2 + $0x60] sm:$0xff]  ;;  %v83_v22 = vld [vmem:[#allocation2 + $0x150] sm:$0xff] }
  0x21   :  { %203 = vadd.xlane.f32.xlu1 %v202_v28  ;;  %v54_v17 = vld [vmem:[#allocation2 + $0x68] sm:$0xff]  ;;  %v211_v18 = vadd.f32 %v70_v15, %v69_v14  ;;  %v97_v20 = vld [vmem:[#allocation2 + $0x1c0] sm:$0xff]  ;;  %v84_v23 = vld [vmem:[#allocation2 + $0x158] sm:$0xff] }
  0x22   :  { %179 = vadd.xlane.f32.xlu0 %v178_v29  ;;  %v187_v19 = vadd.f32 %v54_v17, %v53_v16  ;;  %v98_v21 = vld [vmem:[#allocation2 + $0x1c8] sm:$0xff]  ;;  %v232_v25 = vadd.f32 %v84_v23, %v83_v22  ;;  %v125_v26 = vld [vmem:[#allocation2 + $0x2a0] sm:$0xff]  ;;  %v111_v28 = vld [vmem:[#allocation2 + $0x230] sm:$0xff] }
  0x23   :  { %v253_v24 = vadd.f32 %v98_v21, %v97_v20  ;;  %v126_v27 = vld [vmem:[#allocation2 + $0x2a8] sm:$0xff]  ;;  %v112_v29 = vld [vmem:[#allocation2 + $0x238] sm:$0xff]  ;;  %v139_v32 = vld [vmem:[#allocation2 + $0x310] sm:$0xff] }
  0x24   :  { %v295_v30 = vadd.f32 %v126_v27, %v125_v26  ;;  %v274_v31 = vadd.f32 %v112_v29, %v111_v28  ;;  %v140_v33 = vld [vmem:[#allocation2 + $0x318] sm:$0xff]  ;;  %v71_v38 = vld [vmem:[#allocation2 + $0xf0] sm:$0xff]  ;;  %v153_v56 = vld [vmem:[#allocation2 + $0x380] sm:$0xff] }
  0x25   :  { %242 = vadd.xlane.f32.xlu1 %v241_v34  ;;  %v137_v34 = vld [vmem:[#allocation2 + $0x300] sm:$0xff]  ;;  %v316_v36 = vadd.f32 %v140_v33, %v139_v32  ;;  %v72_v39 = vld [vmem:[#allocation2 + $0xf8] sm:$0xff]  ;;  %v99_v44 = vld [vmem:[#allocation2 + $0x1d0] sm:$0xff] }
  0x26   :  { %224 = vadd.xlane.f32.xlu0 %v223_v35  ;;  %v138_v35 = vld [vmem:[#allocation2 + $0x308] sm:$0xff]  ;;  %v214_v42 = vadd.f32 %v72_v39, %v71_v38  ;;  %v100_v45 = vld [vmem:[#allocation2 + $0x1d8] sm:$0xff]  ;;  %v127_v50 = vld [vmem:[#allocation2 + $0x2b0] sm:$0xff] }
  0x27   :  { %v313_v37 = vadd.f32 %v138_v35, %v137_v34  ;;  %v256_v48 = vadd.f32 %v100_v45, %v99_v44  ;;  %v128_v51 = vld [vmem:[#allocation2 + $0x2b8] sm:$0xff]  ;;  %v154_v57 = vld [vmem:[#allocation2 + $0x388] sm:$0xff]  ;;  %v87_v62 = vld [vmem:[#allocation2 + $0x170] sm:$0xff] }
  0x28   :  { %v298_v54 = vadd.f32 %v128_v51, %v127_v50  ;;  %v337_v60 = vadd.f32 %v154_v57, %v153_v56  ;;  %v88_v63 = vld [vmem:[#allocation2 + $0x178] sm:$0xff]  ;;  %v115_v4 = vld [vmem:[#allocation2 + $0x250] sm:$0xff]  ;;  %v133_v34 = vld [vmem:[#allocation2 + $0x2e0] sm:$0xff] }
  0x29   :  { %182 = vadd.xlane.f32.xlu1 %v181_v40  ;;  %v55_v40 = vld [vmem:[#allocation2 + $0x70] sm:$0xff]  ;;  %v238_v2 = vadd.f32 %v88_v63, %v87_v62  ;;  %v116_v5 = vld [vmem:[#allocation2 + $0x258] sm:$0xff]  ;;  %v134_v35 = vld [vmem:[#allocation2 + $0x2e8] sm:$0xff] }
  0x2a   :  { %245 = vadd.xlane.f32.xlu0 %v244_v41  ;;  %v56_v41 = vld [vmem:[#allocation2 + $0x78] sm:$0xff]  ;;  %v280_v8 = vadd.f32 %v116_v5, %v115_v4  ;;  %v143_v10 = vld [vmem:[#allocation2 + $0x330] sm:$0xff]  ;;  %v307_v38 = vadd.f32 %v134_v35, %v133_v34  ;;  %v430_v4 = vld [vmem:[%s1521_s1 + $0x28] sm:$0xff] }
  0x2b   :  { %v190_v43 = vadd.f32 %v56_v41, %v55_v40  ;;  %v144_v11 = vld [vmem:[#allocation2 + $0x338] sm:$0xff]  ;;  %v103_v16 = vld [vmem:[#allocation2 + $0x1f0] sm:$0xff]  ;;  %v161_v40 = vld [vmem:[#allocation2 + $0x3c0] sm:$0xff] }
  0x2c   :  { %v322_v14 = vadd.f32 %v144_v11, %v143_v10  ;;  %v104_v17 = vld [vmem:[#allocation2 + $0x1f8] sm:$0xff]  ;;  %v131_v22 = vld [vmem:[#allocation2 + $0x2d0] sm:$0xff]  ;;  %v162_v41 = vld [vmem:[#allocation2 + $0x3c8] sm:$0xff] }
  0x2d   :  { %227 = vadd.xlane.f32.xlu1 %v226_v46  ;;  %v85_v46 = vld [vmem:[#allocation2 + $0x160] sm:$0xff]  ;;  %v262_v20 = vadd.f32 %v104_v17, %v103_v16  ;;  %v132_v23 = vld [vmem:[#allocation2 + $0x2d8] sm:$0xff]  ;;  %v159_v28 = vld [vmem:[#allocation2 + $0x3b0] sm:$0xff]  ;;  %v349_v44 = vadd.f32 %v162_v41, %v161_v40 }
  0x2e   :  { %206 = vadd.xlane.f32.xlu0 %v205_v47  ;;  %v86_v47 = vld [vmem:[#allocation2 + $0x168] sm:$0xff]  ;;  %v304_v26 = vadd.f32 %v132_v23, %v131_v22  ;;  %v160_v29 = vld [vmem:[#allocation2 + $0x3b8] sm:$0xff]  ;;  %v429_v5 = vld [vmem:[%s1521_s1 + $0x20] sm:$0xff] }
  0x2f   :  { %v235_v49 = vadd.f32 %v86_v47, %v85_v46  ;;  %v346_v32 = vadd.f32 %v160_v29, %v159_v28  ;;  %v149_v46 = vld [vmem:[#allocation2 + $0x360] sm:$0xff]  ;;  %v150_v47 = vld [vmem:[#allocation2 + $0x368] sm:$0xff]  ;;  %v427_v10 = vld [vmem:[%s1521_s1 + $0x10] sm:$0xff] }
  0x30   :  { %v331_v50 = vadd.f32 %v150_v47, %v149_v46  ;;  %v923_v23 = vld [vmem:[%s1523_s3 + $0x18] sm:$0xff] }
  0x31   :  { %266 = vadd.xlane.f32.xlu1 %v265_v52  ;;  %v113_v52 = vld [vmem:[#allocation2 + $0x240] sm:$0xff] }
  0x32   :  { %248 = vadd.xlane.f32.xlu0 %v247_v53  ;;  %v114_v53 = vld [vmem:[#allocation2 + $0x248] sm:$0xff] }
  0x33   :  { %v277_v55 = vadd.f32 %v114_v53, %v113_v52  ;;  %v151_v52 = vld [vmem:[#allocation2 + $0x370] sm:$0xff]  ;;  %v152_v53 = vld [vmem:[#allocation2 + $0x378] sm:$0xff] }
  0x34   :  { %v334_v56 = vadd.f32 %v152_v53, %v151_v52 }
  0x35   :  { %185 = vadd.xlane.f32.xlu1 %v184_v58  ;;  %v141_v58 = vld [vmem:[#allocation2 + $0x320] sm:$0xff] }
  0x36   :  { %269 = vadd.xlane.f32.xlu0 %v268_v59  ;;  %v142_v59 = vld [vmem:[#allocation2 + $0x328] sm:$0xff] }
  0x37   :  { %v319_v61 = vadd.f32 %v142_v59, %v141_v58  ;;  %v167_v58 = vld [vmem:[#allocation2 + $0x3f0] sm:$0xff]  ;;  %v168_v59 = vld [vmem:[#allocation2 + $0x3f8] sm:$0xff] }
  0x38   :  { %v358_v62 = vadd.f32 %v168_v59, %v167_v58 }
  0x39   :  { %230 = vadd.xlane.f32.xlu1 %v229_v0  ;;  %v155_v0 = vld [vmem:[#allocation2 + $0x390] sm:$0xff] }
  0x3a   :  { %209 = vadd.xlane.f32.xlu0 %v208_v1  ;;  %v156_v1 = vld [vmem:[#allocation2 + $0x398] sm:$0xff] }
  0x3b   :  { %v340_v3 = vadd.f32 %v156_v1, %v155_v0  ;;  %v1218_v0 = vmov 0.0   ;;  %v432_v1 = vld [vmem:[%s1521_s1 + $0x38] sm:$0xff] }
  0x3c   :  { %1128 = vmatprep.subr.mxu0 %v1218_v0  ;;  %1147 = vmatprep.subr.mxu1 %v1218_v0 }
  0x3d   :  { %272 = vadd.xlane.f32.xlu1 %v271_v6  ;;  %v101_v6 = vld [vmem:[#allocation2 + $0x1e0] sm:$0xff]  ;;  %1129 = vmatpush3.msra.mxu0 %v432_v1 }
  0x3e   :  { %251 = vadd.xlane.f32.xlu0 %v250_v7  ;;  %v102_v7 = vld [vmem:[#allocation2 + $0x1e8] sm:$0xff]  ;;  %1130 = vmatprep.subr.mxu0 %v1218_v0 }
  0x3f   :  { %v259_v9 = vadd.f32 %v102_v7, %v101_v6  ;;  %v428_v7 = vld [vmem:[%s1521_s1 + $0x18] sm:$0xff]  ;;  %1144 = vmatprep.mubr.msk.f32.mxu0 %vm1219_vm0, %v1218_v0  ;;  %1155 = vmatprep.mubr.msk.f32.mxu1 %vm1219_vm0, %v1218_v0 }
  0x40   :  { %1148 = vmatpush3.msra.mxu1 %v923_v23 }
  0x41   :  { %293 = vadd.xlane.f32.xlu1 %v292_v12  ;;  %v129_v12 = vld [vmem:[#allocation2 + $0x2c0] sm:$0xff]  ;;  %1149 = vmatprep.subr.mxu1 %v1218_v0 }
  0x42   :  { %290 = vadd.xlane.f32.xlu0 %v289_v13  ;;  %v130_v13 = vld [vmem:[#allocation2 + $0x2c8] sm:$0xff] }
  0x43   :  { %v301_v15 = vadd.f32 %v130_v13, %v129_v12  ;;  %v426_v13 = vld [vmem:[%s1521_s1 + $0x8] sm:$0xff] }
  0x45   :  { %212 = vadd.xlane.f32.xlu1 %v211_v18  ;;  %v157_v18 = vld [vmem:[#allocation2 + $0x3a0] sm:$0xff] }
  0x46   :  { %188 = vadd.xlane.f32.xlu0 %v187_v19  ;;  %v158_v19 = vld [vmem:[#allocation2 + $0x3a8] sm:$0xff] }
  0x47   :  { %v343_v21 = vadd.f32 %v158_v19, %v157_v18 }
  0x49   :  { %254 = vadd.xlane.f32.xlu1 %v253_v24  ;;  %v117_v24 = vld [vmem:[#allocation2 + $0x260] sm:$0xff] }
  0x4a   :  { %233 = vadd.xlane.f32.xlu0 %v232_v25  ;;  %v118_v25 = vld [vmem:[#allocation2 + $0x268] sm:$0xff] }
  0x4b   :  { %v283_v27 = vadd.f32 %v118_v25, %v117_v24 }
  0x4d   :  { %296 = vadd.xlane.f32.xlu1 %v295_v30  ;;  %v145_v30 = vld [vmem:[#allocation2 + $0x340] sm:$0xff] }
  0x4e   :  { %275 = vadd.xlane.f32.xlu0 %v274_v31  ;;  %v146_v31 = vld [vmem:[#allocation2 + $0x348] sm:$0xff] }
  0x4f   :  { %v325_v33 = vadd.f32 %v146_v31, %v145_v30 }
  0x51   :  { %317 = vadd.xlane.f32.xlu1 %v316_v36  ;;  %v119_v36 = vld [vmem:[#allocation2 + $0x270] sm:$0xff] }
  0x52   :  { %314 = vadd.xlane.f32.xlu0 %v313_v37  ;;  %v120_v37 = vld [vmem:[#allocation2 + $0x278] sm:$0xff] }
  0x53   :  { %v286_v39 = vadd.f32 %v120_v37, %v119_v36 }
  0x55   :  { %215 = vadd.xlane.f32.xlu1 %v214_v42  ;;  %v147_v42 = vld [vmem:[#allocation2 + $0x350] sm:$0xff] }
  0x56   :  { %191 = vadd.xlane.f32.xlu0 %v190_v43  ;;  %v148_v43 = vld [vmem:[#allocation2 + $0x358] sm:$0xff] }
  0x57   :  { %v328_v45 = vadd.f32 %v148_v43, %v147_v42 }
  0x59   :  { %257 = vadd.xlane.f32.xlu1 %v256_v48  ;;  %v135_v48 = vld [vmem:[#allocation2 + $0x2f0] sm:$0xff] }
  0x5a   :  { %236 = vadd.xlane.f32.xlu0 %v235_v49  ;;  %v136_v49 = vld [vmem:[#allocation2 + $0x2f8] sm:$0xff] }
  0x5b   :  { %v310_v51 = vadd.f32 %v136_v49, %v135_v48 }
  0x5d   :  { %299 = vadd.xlane.f32.xlu1 %v298_v54  ;;  %v163_v54 = vld [vmem:[#allocation2 + $0x3d0] sm:$0xff] }
  0x5e   :  { %278 = vadd.xlane.f32.xlu0 %v277_v55  ;;  %v164_v55 = vld [vmem:[#allocation2 + $0x3d8] sm:$0xff] }
  0x5f   :  { %v352_v57 = vadd.f32 %v164_v55, %v163_v54 }
  0x61   :  { %338 = vadd.xlane.f32.xlu1 %v337_v60  ;;  %v165_v60 = vld [vmem:[#allocation2 + $0x3e0] sm:$0xff] }
  0x62   :  { %320 = vadd.xlane.f32.xlu0 %v319_v61  ;;  %v166_v61 = vld [vmem:[#allocation2 + $0x3e8] sm:$0xff] }
  0x63   :  { %v355_v63 = vadd.f32 %v166_v61, %v165_v60 }
  0x65   :  { %239 = vadd.xlane.f32.xlu1 %v238_v2  ;;  %v431_v2 = vld [vmem:[%s1521_s1 + $0x30] sm:$0xff] }
  0x66   :  { %341 = vadd.xlane.f32.xlu0 %v340_v3  ;;  %1131 = vmatpush3.msra.mxu0 %v431_v2  ;;  %v504_v3 = vlaneseq }
  0x67   :  { %1132 = vmatprep.subr.mxu0 %v1218_v0 }
  0x68   :  { %1133 = vmatpush3.msra.mxu0 %v430_v4  ;;  %v1281_v6 = vand.u32 127, %v504_v3 }
  0x69   :  { %281 = vadd.xlane.f32.xlu1 %v280_v8  ;;  %1134 = vmatprep.subr.mxu0 %v1218_v0  ;;  %v1287_v8 = vshrl.u32 %v504_v3, 7 }
  0x6a   :  { %260 = vadd.xlane.f32.xlu0 %v259_v9  ;;  %1135 = vmatpush3.msra.mxu0 %v429_v5  ;;  %v510_v9 = vadd.s32 4294967288, %v1281_v6  ;;  %v517_v18 = vadd.s32 4294967280, %v1281_v6  ;;  %v524_v37 = vadd.s32 4294967272, %v1281_v6  ;;  %v531_v54 = vadd.s32 4294967264, %v1281_v6 }
  0x6b   :  { %1136 = vmatprep.subr.mxu0 %v1218_v0 }
  0x6c   :  { %1137 = vmatpush3.msra.mxu0 %v428_v7  ;;  %v1306_v17 = vsub.s32 %v510_v9, %v1287_v8  ;;  %v1334_v46 = vsub.s32 %v524_v37, %v1287_v8  ;;  %v1344_v61 = vsub.s32 %v531_v54, %v1287_v8 }
  0x6d   :  { %323 = vadd.xlane.f32.xlu1 %v322_v14  ;;  %1138 = vmatprep.subr.mxu0 %v1218_v0  ;;  %v425_v14 = vld [vmem:[%s1521_s1] sm:$0xff] }
  0x6e   :  { %302 = vadd.xlane.f32.xlu0 %v301_v15  ;;  %1139 = vmatpush3.msra.mxu0 %v427_v10  ;;  %v1303_v15 = vsub.s32 %v1281_v6, %v1287_v8 }
  0x6f   :  { %1140 = vmatprep.subr.mxu0 %v1218_v0 }
  0x70   :  { %1141 = vmatpush3.msra.mxu0 %v426_v13 }
  0x71   :  { %263 = vadd.xlane.f32.xlu1 %v262_v20  ;;  %1142 = vmatprep.subr.mxu0 %v1218_v0 }
  0x72   :  { %344 = vadd.xlane.f32.xlu0 %v343_v21  ;;  %1143 = vmatpush3.msra.mxu0 %v425_v14 }
  0x75   :  { %305 = vadd.xlane.f32.xlu1 %v304_v26 }
  0x76   :  { %284 = vadd.xlane.f32.xlu0 %v283_v27  ;;  %v1320_v27 = vsub.s32 %v517_v18, %v1287_v8 }
  0x79   :  { %347 = vadd.xlane.f32.xlu1 %v346_v32 }
  0x7a   :  { %326 = vadd.xlane.f32.xlu0 %v325_v33 }
  0x7d   :  { %308 = vadd.xlane.f32.xlu1 %v307_v38 }
  0x7e   :  { %287 = vadd.xlane.f32.xlu0 %v286_v39 }
  0x81   :  { %350 = vadd.xlane.f32.xlu1 %v349_v44 }
  0x82   :  { %329 = vadd.xlane.f32.xlu0 %v328_v45 }
  0x85   :  { %332 = vadd.xlane.f32.xlu1 %v331_v50 }
  0x86   :  { %311 = vadd.xlane.f32.xlu0 %v310_v51 }
  0x89   :  { %335 = vadd.xlane.f32.xlu1 %v334_v56 }
  0x8a   :  { %353 = vadd.xlane.f32.xlu0 %v352_v57 }
  0x8d   :  { %359 = vadd.xlane.f32.xlu1 %v358_v62 }
  0x8e   :  { %356 = vadd.xlane.f32.xlu0 %v355_v63 }
  0x9a   :  { %v195_v11 = vpop.xlane.xlu1 %194 }
  0x9b   :  { %v171_v12 = vpop.xlane.xlu0 %170  ;;  %v369_v16 = vmul.f32 0.00390625, %v195_v11 }
  0x9c   :  { %v361_v19 = vmul.f32 0.00390625, %v171_v12 }
  0x9d   :  { %v562_v25 = vrot.slane %v369_v16, %v1303_v15 }
  0x9e   :  { %v198_v20 = vpop.xlane.xlu1 %197  ;;  %v509_v28 = vrot.slane %v361_v19, %v1303_v15 }
  0x9f   :  { %v370_v21 = vmul.f32 0.00390625, %v198_v20  ;;  %v174_v22 = vpop.xlane.xlu0 %173  ;;  %v538_v20 = vadd.s32 4294967256, %v1281_v6 }
  0xa0   :  { %v362_v24 = vmul.f32 0.00390625, %v174_v22 }
  0xa1   :  { %v566_v26 = vrot.slane %v370_v21, %v1306_v17 }
  0xa2   :  { %v514_v29 = vrot.slane %v362_v24, %v1306_v17  ;;  %v201_v30 = vpop.xlane.xlu1 %200 }
  0xa3   :  { %v567_v31 = vsel %vm515_vm1, %v566_v26, %v562_v25  ;;  %v371_v32 = vmul.f32 0.00390625, %v201_v30  ;;  %v177_v33 = vpop.xlane.xlu0 %176 }
  0xa4   :  { %v516_v34 = vsel %vm515_vm1, %v514_v29, %v509_v28  ;;  %v363_v35 = vmul.f32 0.00390625, %v177_v33  ;;  %v1359_v28 = vsub.s32 %v538_v20, %v1287_v8 }
  0xa5   :  { %v571_v36 = vrot.slane %v371_v32, %v1320_v27 }
  0xa6   :  { %v521_v38 = vrot.slane %v363_v35, %v1320_v27  ;;  %v222_v39 = vpop.xlane.xlu1 %221 }
  0xa7   :  { %v572_v40 = vsel %vm522_vm2, %v571_v36, %v567_v31  ;;  %v378_v41 = vmul.f32 0.00390625, %v222_v39  ;;  %v219_v42 = vpop.xlane.xlu0 %218 }
  0xa8   :  { %v523_v43 = vsel %vm522_vm2, %v521_v38, %v516_v34  ;;  %v377_v44 = vmul.f32 0.00390625, %v219_v42 }
  0xa9   :  { %v605_v45 = vrot.slane %v378_v41, %v1306_v17 }
  0xaa   :  { %v601_v47 = vrot.slane %v377_v44, %v1303_v15  ;;  %v204_v48 = vpop.xlane.xlu1 %203 }
  0xab   :  { %v372_v49 = vmul.f32 0.00390625, %v204_v48  ;;  %v180_v50 = vpop.xlane.xlu0 %179 }
  0xac   :  { %v606_v51 = vsel %vm515_vm1, %v605_v45, %v601_v47  ;;  %v364_v52 = vmul.f32 0.00390625, %v180_v50 }
  0xad   :  { %v576_v53 = vrot.slane %v372_v49, %v1334_v46 }
  0xae   :  { %v528_v55 = vrot.slane %v364_v52, %v1334_v46  ;;  %v243_v56 = vpop.xlane.xlu1 %242 }
  0xaf   :  { %v577_v57 = vsel %vm529_vm3, %v576_v53, %v572_v40  ;;  %v225_v58 = vpop.xlane.xlu0 %224  ;;  %v385_v62 = vmul.f32 0.00390625, %v243_v56 }
  0xb0   :  { %v530_v59 = vsel %vm529_vm3, %v528_v55, %v523_v43  ;;  %v379_v60 = vmul.f32 0.00390625, %v225_v58  ;;  %v545_v55 = vadd.s32 4294967248, %v1281_v6 }
  0xb1   :  { %v640_v9 = vrot.slane %v385_v62, %v1303_v15 }
  0xb2   :  { %v610_v63 = vrot.slane %v379_v60, %v1320_v27  ;;  %v183_v1 = vpop.xlane.xlu1 %182 }
  0xb3   :  { %v365_v2 = vmul.f32 0.00390625, %v183_v1  ;;  %v246_v3 = vpop.xlane.xlu0 %245 }
  0xb4   :  { %v611_v4 = vsel %vm522_vm2, %v610_v63, %v606_v51  ;;  %v386_v5 = vmul.f32 0.00390625, %v246_v3 }
  0xb5   :  { %v535_v7 = vrot.slane %v365_v2, %v1344_v61  ;;  %v1383_v2 = vsub.s32 %v545_v55, %v1287_v8 }
  0xb6   :  { %v644_v10 = vrot.slane %v386_v5, %v1306_v17  ;;  %v228_v11 = vpop.xlane.xlu1 %227 }
  0xb7   :  { %v537_v12 = vsel %vm536_vm4, %v535_v7, %v530_v59  ;;  %v380_v13 = vmul.f32 0.00390625, %v228_v11  ;;  %v207_v14 = vpop.xlane.xlu0 %206 }
  0xb8   :  { %v645_v16 = vsel %vm515_vm1, %v644_v10, %v640_v9  ;;  %v373_v18 = vmul.f32 0.00390625, %v207_v14 }
  0xb9   :  { %v615_v19 = vrot.slane %v380_v13, %v1334_v46 }
  0xba   :  { %v581_v21 = vrot.slane %v373_v18, %v1344_v61  ;;  %v267_v22 = vpop.xlane.xlu1 %266 }
  0xbb   :  { %v616_v23 = vsel %vm529_vm3, %v615_v19, %v611_v4  ;;  %v249_v24 = vpop.xlane.xlu0 %248  ;;  %v393_v29 = vmul.f32 0.00390625, %v267_v22 }
  0xbc   :  { %v582_v25 = vsel %vm536_vm4, %v581_v21, %v577_v57  ;;  %v387_v26 = vmul.f32 0.00390625, %v249_v24  ;;  %v552_v21 = vadd.s32 4294967240, %v1281_v6 }
  0xbd   :  { %v679_v37 = vrot.slane %v393_v29, %v1303_v15 }
  0xbe   :  { %v649_v30 = vrot.slane %v387_v26, %v1320_v27  ;;  %v186_v31 = vpop.xlane.xlu1 %185  ;;  %v1399_v24 = vsub.s32 %v552_v21, %v1287_v8 }
  0xbf   :  { %v366_v32 = vmul.f32 0.00390625, %v186_v31  ;;  %v270_v33 = vpop.xlane.xlu0 %269 }
  0xc0   :  { %v650_v34 = vsel %vm522_vm2, %v649_v30, %v645_v16  ;;  %v394_v35 = vmul.f32 0.00390625, %v270_v33 }
  0xc1   :  { %v542_v36 = vrot.slane %v366_v32, %v1359_v28 }
  0xc2   :  { %v683_v38 = vrot.slane %v394_v35, %v1306_v17  ;;  %v231_v39 = vpop.xlane.xlu1 %230 }
  0xc3   :  { %v544_v40 = vsel %vm543_vm5, %v542_v36, %v537_v12  ;;  %v381_v41 = vmul.f32 0.00390625, %v231_v39  ;;  %v210_v42 = vpop.xlane.xlu0 %209 }
  0xc4   :  { %v684_v43 = vsel %vm515_vm1, %v683_v38, %v679_v37  ;;  %v374_v44 = vmul.f32 0.00390625, %v210_v42 }
  0xc5   :  { %v620_v45 = vrot.slane %v381_v41, %v1344_v61 }
  0xc6   :  { %v586_v47 = vrot.slane %v374_v44, %v1359_v28  ;;  %v273_v48 = vpop.xlane.xlu1 %272 }
  0xc7   :  { %v621_v49 = vsel %vm536_vm4, %v620_v45, %v616_v23  ;;  %v395_v50 = vmul.f32 0.00390625, %v273_v48  ;;  %v252_v51 = vpop.xlane.xlu0 %251 }
  0xc8   :  { %v587_v52 = vsel %vm543_vm5, %v586_v47, %v582_v25  ;;  %v388_v53 = vmul.f32 0.00390625, %v252_v51 }
  0xc9   :  { %v688_v54 = vrot.slane %v395_v50, %v1320_v27 }
  0xca   :  { %v654_v56 = vrot.slane %v388_v53, %v1334_v46  ;;  %v294_v57 = vpop.xlane.xlu1 %293 }
  0xcb   :  { %v1376_v58 = vsel %vm522_vm2, %v688_v54, %v684_v43  ;;  %v402_v59 = vmul.f32 0.00390625, %v294_v57  ;;  %v291_v60 = vpop.xlane.xlu0 %290 }
  0xcc   :  { %v1379_v62 = vsel %vm529_vm3, %v654_v56, %v650_v34  ;;  %v401_v63 = vmul.f32 0.00390625, %v291_v60 }
  0xcd   :  { %v722_v1 = vrot.slane %v402_v59, %v1306_v17 }
  0xce   :  { %v718_v3 = vrot.slane %v401_v63, %v1303_v15  ;;  %v213_v4 = vpop.xlane.xlu1 %212 }
  0xcf   :  { %v375_v5 = vmul.f32 0.00390625, %v213_v4  ;;  %v189_v7 = vpop.xlane.xlu0 %188 }
  0xd0   :  { %v1387_v9 = vsel %vm515_vm1, %v722_v1, %v718_v3  ;;  %v367_v10 = vmul.f32 0.00390625, %v189_v7 }
  0xd1   :  { %v591_v11 = vrot.slane %v375_v5, %v1383_v2 }
  0xd2   :  { %v549_v12 = vrot.slane %v367_v10, %v1383_v2  ;;  %v255_v13 = vpop.xlane.xlu1 %254 }
  0xd3   :  { %v592_v14 = vsel %vm550_vm6, %v591_v11, %v587_v52  ;;  %v234_v16 = vpop.xlane.xlu0 %233  ;;  %v389_v55 = vmul.f32 0.00390625, %v255_v13 }
  0xd4   :  { %v551_v18 = vsel %vm550_vm6, %v549_v12, %v544_v40  ;;  %v382_v38 = vmul.f32 0.00390625, %v234_v16 }
  0xd5   :  { %v659_v1 = vrot.slane %v389_v55, %v1344_v61 }
  0xd6   :  { %v1393_v19 = vpop.xlane.xlu1 %296  ;;  %v625_v42 = vrot.slane %v382_v38, %v1359_v28 }
  0xd7   :  { %v276_v20 = vpop.xlane.xlu0 %275  ;;  %v660_v10 = vsel %vm536_vm4, %v659_v1, %v1379_v62 }
  0xd8   :  { %v626_v48 = vsel %vm543_vm5, %v625_v42, %v621_v49  ;;  %v396_v21 = vmul.f32 0.00390625, %v276_v20 }
  0xda   :  { %v318_v22 = vpop.xlane.xlu1 %317  ;;  %v693_v62 = vrot.slane %v396_v21, %v1334_v46 }
  0xdb   :  { %v1396_v23 = vpop.xlane.xlu0 %314 }
  0xdc   :  { %v694_v42 = vsel %vm529_vm3, %v693_v62, %v1376_v58 }
  0xde   :  { %v216_v25 = vpop.xlane.xlu1 %215 }
  0xdf   :  { %v376_v26 = vmul.f32 0.00390625, %v216_v25  ;;  %v192_v29 = vpop.xlane.xlu0 %191 }
  0xe0   :  { %v368_v30 = vmul.f32 0.00390625, %v192_v29 }
  0xe1   :  { %v596_v31 = vrot.slane %v376_v26, %v1399_v24 }
  0xe2   :  { %v556_v32 = vrot.slane %v368_v30, %v1399_v24  ;;  %v258_v33 = vpop.xlane.xlu1 %257 }
  0xe3   :  { %v597_v34 = vsel %vm557_vm7, %v596_v31, %v592_v14  ;;  %v237_v6 = vpop.xlane.xlu0 %236  ;;  %v390_v57 = vmul.f32 0.00390625, %v258_v33  ;;  %v403_v33 = vmul.f32 0.00390625, %v1393_v19 }
  0xe4   :  { %v558_v35 = vsel %vm557_vm7, %v556_v32, %v551_v18  ;;  %v383_v39 = vmul.f32 0.00390625, %v237_v6 }
  0xe5   :  { %v833_v36 = vsel %vm832_vm8, %v597_v34, %v558_v35  ;;  %v664_v3 = vrot.slane %v390_v57, %v1359_v28  ;;  %v410_v34 = vmul.f32 0.00390625, %v318_v22  ;;  %v409_v35 = vmul.f32 0.00390625, %v1396_v23 }
  0xe6   :  { %v300_v37 = vpop.xlane.xlu1 %299  ;;  %v630_v43 = vrot.slane %v383_v39, %v1383_v2 }
  0xe7   :  { %v279_v8 = vpop.xlane.xlu0 %278  ;;  %v665_v11 = vsel %vm543_vm5, %v664_v3, %v660_v10  ;;  %v404_v39 = vmul.f32 0.00390625, %v300_v37  ;;  %v761_v19 = vrot.slane %v410_v34, %v1306_v17  ;;  %v757_v23 = vrot.slane %v409_v35, %v1303_v15 }
  0xe8   :  { %v631_v51 = vsel %vm550_vm6, %v630_v43, %v626_v48  ;;  %v397_v26 = vmul.f32 0.00390625, %v279_v8 }
  0xe9   :  { %v762_v3 = vsel %vm515_vm1, %v761_v19, %v757_v23 }
  0xea   :  { %v1405_v40 = vpop.xlane.xlu1 %338  ;;  %v698_v6 = vrot.slane %v397_v26, %v1344_v61 }
  0xeb   :  { %v1407_v41 = vpop.xlane.xlu0 %320  ;;  %v417_v55 = vmul.f32 0.00390625, %v1405_v40 }
  0xec   :  { %v699_v22 = vsel %vm536_vm4, %v698_v6, %v694_v42  ;;  %v411_v57 = vmul.f32 0.00390625, %v1407_v41 }
  0xee   :  { %v240_v44 = vpop.xlane.xlu1 %239 }
  0xef   :  { %v384_v45 = vmul.f32 0.00390625, %v240_v44  ;;  %v1411_v47 = vpop.xlane.xlu0 %341  ;;  %v727_v44 = vrot.slane %v403_v33, %v1320_v27 }
  0xf0   :  { %v418_v10 = vmul.f32 0.00390625, %v1411_v47 }
  0xf1   :  { %v635_v50 = vrot.slane %v384_v45, %v1399_v24  ;;  %v728_v1 = vsel %vm522_vm2, %v727_v44, %v1387_v9  ;;  %v766_v9 = vrot.slane %v411_v57, %v1320_v27 }
  0xf2   :  { %v282_v52 = vpop.xlane.xlu1 %281  ;;  %v800_v62 = vrot.slane %v418_v10, %v1306_v17  ;;  %v1107_v10 = vld [vmem:[%s1524_s4] ss:$0 sm:$0xff] }
  0xf3   :  { %v636_v53 = vsel %vm557_vm7, %v635_v50, %v631_v51  ;;  %v261_v54 = vpop.xlane.xlu0 %260  ;;  %v398_v29 = vmul.f32 0.00390625, %v282_v52  ;;  %v732_v52 = vrot.slane %v404_v39, %v1334_v46 }
  0xf4   :  { %v835_v56 = vsel %vm834_vm9, %v636_v53, %v833_v36  ;;  %v391_v59 = vmul.f32 0.00390625, %v261_v54 }
  0xf5   :  { %v703_v36 = vrot.slane %v398_v29, %v1359_v28  ;;  %v733_v40 = vsel %vm529_vm3, %v732_v52, %v728_v1 }
  0xf6   :  { %v324_v60 = vpop.xlane.xlu1 %323  ;;  %v669_v49 = vrot.slane %v391_v59, %v1383_v2 }
  0xf7   :  { %v303_v63 = vpop.xlane.xlu0 %302  ;;  %v704_v48 = vsel %vm543_vm5, %v703_v36, %v699_v22 }
  0xf8   :  { %v670_v13 = vsel %vm550_vm6, %v669_v49, %v665_v11  ;;  %v405_v45 = vmul.f32 0.00390625, %v303_v63  ;;  %v412_v49 = vmul.f32 0.00390625, %v324_v60 }
  0xfa   :  { %v264_v4 = vpop.xlane.xlu1 %263  ;;  %v737_v59 = vrot.slane %v405_v45, %v1344_v61  ;;  %v771_v26 = vrot.slane %v412_v49, %v1334_v46 }
  0xfb   :  { %v392_v5 = vmul.f32 0.00390625, %v264_v4  ;;  %v345_v7 = vpop.xlane.xlu0 %344 }
  0xfc   :  { %v738_v60 = vsel %vm536_vm4, %v737_v59, %v733_v40  ;;  %v920_v59 = vld [vmem:[%s1523_s3] sm:$0xff] }
  0xfd   :  { %v674_v12 = vrot.slane %v392_v5, %v1399_v24  ;;  %v1006_v40 = vld [vmem:[%s1525_s5] sm:$0xff] }
  0xfe   :  { %v306_v14 = vpop.xlane.xlu1 %305 }
  0xff   :  { %v675_v16 = vsel %vm557_vm7, %v674_v12, %v670_v13  ;;  %v285_v18 = vpop.xlane.xlu0 %284  ;;  %v406_v37 = vmul.f32 0.00390625, %v306_v14  ;;  %v796_v13 = vrot.slane %v417_v55, %v1303_v15  ;;  %v419_v14 = vmul.f32 0.00390625, %v345_v7 }
 0x100   :  { %v837_v25 = vsel %vm836_vm10, %v675_v16, %v835_v56  ;;  %v399_v31 = vmul.f32 0.00390625, %v285_v18 }
 0x101   :  { %v742_v4 = vrot.slane %v406_v37, %v1359_v28  ;;  %v805_v6 = vrot.slane %v419_v14, %v1320_v27  ;;  %v801_v44 = vsel %vm515_vm1, %v800_v62, %v796_v13  ;;  %vm931_vm1 = vcmask 261120   ;;  %v1109_v14 = vld [vmem:[%s1526_s6] ss:$0 sm:$0xff] }
 0x102   :  { %v348_v30 = vpop.xlane.xlu1 %347  ;;  %v708_v20 = vrot.slane %v399_v31, %v1383_v2 }
 0x103   :  { %v327_v32 = vpop.xlane.xlu0 %326  ;;  %v420_v21 = vmul.f32 0.00390625, %v348_v30  ;;  %v743_v29 = vsel %vm543_vm5, %v742_v4, %v738_v60 }
 0x104   :  { %v709_v58 = vsel %vm550_vm6, %v708_v20, %v704_v48  ;;  %v413_v11 = vmul.f32 0.00390625, %v327_v32 }
 0x105   :  { %v810_v39 = vrot.slane %v420_v21, %v1334_v46  ;;  %v806_v46 = vsel %vm522_vm2, %v805_v6, %v801_v44 }
 0x106   :  { %v309_v38 = vpop.xlane.xlu1 %308  ;;  %v776_v15 = vrot.slane %v413_v11, %v1344_v61 }
 0x107   :  { %v288_v8 = vpop.xlane.xlu0 %287  ;;  %v407_v53 = vmul.f32 0.00390625, %v309_v38  ;;  %v767_v38 = vsel %vm522_vm2, %v766_v9, %v762_v3 }
 0x108   :  { %v400_v43 = vmul.f32 0.00390625, %v288_v8  ;;  %v772_v8 = vsel %vm529_vm3, %v771_v26, %v767_v38 }
 0x109   :  { %v747_v41 = vrot.slane %v407_v53, %v1383_v2  ;;  %v777_v19 = vsel %vm536_vm4, %v776_v15, %v772_v8 }
 0x10a   :  { %v713_v50 = vrot.slane %v400_v43, %v1399_v24  ;;  %v351_v51 = vpop.xlane.xlu1 %350 }
 0x10b   :  { %v330_v54 = vpop.xlane.xlu0 %329  ;;  %v421_v47 = vmul.f32 0.00390625, %v351_v51  ;;  %v748_v7 = vsel %vm550_vm6, %v747_v41, %v743_v29 }
 0x10c   :  { %v714_v56 = vsel %vm557_vm7, %v713_v50, %v709_v58  ;;  %v414_v16 = vmul.f32 0.00390625, %v330_v54  ;;  %v811_v50 = vsel %vm529_vm3, %v810_v39, %v806_v46 }
 0x10d   :  { %v839_v63 = vsel %vm838_vm11, %v714_v56, %v837_v25  ;;  %v815_v42 = vrot.slane %v421_v47, %v1344_v61 }
 0x10e   :  { %v333_v5 = vpop.xlane.xlu1 %332  ;;  %v781_v30 = vrot.slane %v414_v16, %v1359_v28 }
 0x10f   :  { %v312_v12 = vpop.xlane.xlu0 %311  ;;  %v415_v25 = vmul.f32 0.00390625, %v333_v5  ;;  %v816_v52 = vsel %vm536_vm4, %v815_v42, %v811_v50  ;;  %v1007_v5 = vld [vmem:[%s1525_s5 + $0x8] sm:$0xff]  ;;  %s1191_s5 = scalar_lea.vmem %s1097_s15, 128 }
 0x110   :  { %v408_v18 = vmul.f32 0.00390625, %v312_v12  ;;  %v782_v48 = vsel %vm543_vm5, %v781_v30, %v777_v19  ;;  %p1192_p5 = scmp.ne.s32.totalorder %s1097_s15, %s1191_s5  ;;  %p1197_p7 = scmp.lt.s32.totalorder %s1191_s5, %s1191_s5 }
 0x111   :  { %v786_v20 = vrot.slane %v415_v25, %v1383_v2 }
 0x112   :  { %v752_v31 = vrot.slane %v408_v18, %v1399_v24  ;;  %v336_v32 = vpop.xlane.xlu1 %335  ;;  %p1198_p8 = por %p1197_p7, %p1196_p6 }
 0x113   :  { %v416_v33 = vmul.f32 0.00390625, %v336_v32  ;;  %v354_v34 = vpop.xlane.xlu0 %353  ;;  %v787_v61 = vsel %vm550_vm6, %v786_v20, %v782_v48 }
 0x114   :  { %v753_v35 = vsel %vm557_vm7, %v752_v31, %v748_v7  ;;  %v422_v36 = vmul.f32 0.00390625, %v354_v34  ;;  %p1199_p9 = pnand %p1198_p8, %p1192_p5 }
 0x115   :  { %v841_v17 = vsel %vm840_vm12, %v753_v35, %v839_v63  ;;  %v791_v43 = vrot.slane %v416_v33, %v1399_v24  ;;  %v1105_v63 = vld [vmem:[%s1522_s2] ss:$0 sm:$0xff] }
 0x116   :  { %v360_v27 = vpop.xlane.xlu1 %359  ;;  %v820_v22 = vrot.slane %v422_v36, %v1359_v28 }
 0x117   :  { %v357_v45 = vpop.xlane.xlu0 %356  ;;  %v424_v23 = vmul.f32 0.00390625, %v360_v27  ;;  %v792_v58 = vsel %vm557_vm7, %v791_v43, %v787_v61 }
 0x118   :  { %v423_v37 = vmul.f32 0.00390625, %v357_v45  ;;  %v821_v28 = vsel %vm543_vm5, %v820_v22, %v816_v52  ;;  %v843_v56 = vsel %vm842_vm13, %v792_v58, %v841_v17 }
 0x119   :  { %v830_v51 = vrot.slane %v424_v23, %v1399_v24  ;;  %v922_v24 = vld [vmem:[%s1523_s3 + $0x10] sm:$0xff] }
 0x11a   :  { %v825_v53 = vrot.slane %v423_v37, %v1383_v2  ;;  %1150 = vmatpush3.msra.mxu1 %v922_v24  ;;  %v921_v2 = vld [vmem:[%s1523_s3 + $0x8] sm:$0xff] }
 0x11b   :  { %1151 = vmatprep.subr.mxu1 %v1218_v0 }
 0x11c   :  { %v826_v54 = vsel %vm550_vm6, %v825_v53, %v821_v28  ;;  %1152 = vmatpush3.msra.mxu1 %v921_v2 }
 0x11d   :  { %v831_v55 = vsel %vm557_vm7, %v830_v51, %v826_v54  ;;  %1153 = vmatprep.subr.mxu1 %v1218_v0 }
 0x11e   :  { %v845_v57 = vsel %vm844_vm14, %v831_v55, %v843_v56  ;;  %1154 = vmatpush3.msra.mxu1 %v920_v59 }
 0x11f   :  { %1145 = vmatmul.mubr.msk.f32.vlgmr.msra.gmra.mxu0 %vm846_vm15, %v845_v57  ;;  %1158 = vmatprep.subr.mxu1 %v1218_v0 }
 0x1df   :  { %v915_v1 = vpop.f32.mrf.mxu0 }
 0x1e0   :  { %v916_v3 = vadd.f32 %v1105_v63, %v915_v1 }
 0x1e1   :  { %v1146_v49 = vpop.f32.mrf.mxu0 }
 0x1e2   :  { %v919_v4 = vmax.f32 %v916_v3, 0.0 }
 0x1e4   :  { %1156 = vmatmul.mubr.msk.f32.vlgmr.msra.gmra.mxu1 %vm931_vm1, %v919_v4 }
 0x1e5   :  { %1162 = vmatprep.mubr.msk.f32.mxu1 %vm1219_vm0, %v1218_v0  ;;  %1159 = vmatpush3.msra.mxu1 %v1007_v5  ;;  %vm1015_vm0 = vcmask 130048  }
 0x1e6   :  { %1160 = vmatprep.subr.mxu1 %v1218_v0 }
 0x1e7   :  { %1161 = vmatpush3.msra.mxu1 %v1006_v40 }
 0x2a4   :  { %v1001_v11 = vpop.f32.mrf.mxu1 }
 0x2a5   :  { %v1002_v41 = vadd.f32 %v1107_v10, %v1001_v11 }
 0x2a6   :  { %v1157_v12 = vpop.f32.mrf.mxu1 }
 0x2a7   :  { %v1005_v13 = vmax.f32 %v1002_v41, 0.0 }
 0x2a9   :  { %1163 = vmatmul.mubr.msk.f32.vlgmr.msra.gmra.mxu1 %vm1015_vm0, %v1005_v13 }
 0x369   :  { %v1085_v0 = vpop.f32.mrf.mxu1 }
 0x36a   :  { %v1086_v16 = vadd.f32 %v1109_v14, %v1085_v0 }
 0x36b   :  { %v1164_v18 = vpop.f32.mrf.mxu1 }
 0x36c   :  { %1089 = vst [vmem:[#allocation5] sm:$0xff] %v1086_v16 }
 0x36d   :  { %1202 = shalt.err (!%p1199_p9)
}
 0x36e   :  { %1099 = dma.vmem_to_hbm [thread:$0]  %s1097_s15, 128, %s1527_s7, [#allocation4]  }
 0x36f   :  { %1213 = dma.done.wait [#allocation4], 128  }
 0x370   :  { %1214 = vsyncadd [#allocation4], 4294967168 }
 0x371   :  { %1103 = vsyncpa [#allocation3], 1 }
 0x372   :  { %1104 = vsyncpa [#allocation4], 1 }

</bundles_post_ra>
